<compile_context>
chip_gen: v6e
topology: v6e:2x2x1
jax: 0.10.0
libtpu: 0.0.40
codegen_flags: <defaults>
</compile_context>

<pallas_src>
import functools
import math

import jax
import jax.numpy as jnp
from jax.experimental import pallas as pl
from jax.experimental.pallas import tpu as pltpu


def _round_up(n: int, m: int) -> int:
    return ((n + m - 1) // m) * m


def _device_vmem_bytes() -> int:
    try:
        info = pltpu.get_tpu_info()
        cap = getattr(info, "vmem_capacity_bytes", None)
        if cap:
            return int(cap)
    except Exception:
        pass
    return 64 << 20  # conservative default (v7x per-TensorCore VMEM)


# --------------------------------------------------------------------------
# Path 1: small vocab -> one-hot x table on the MXU (no serial loop).
# --------------------------------------------------------------------------
def _onehot_kernel(ids_ref, table_ref, out_ref, *, scale):
    # ids_ref  : VMEM (tm, 1)     int32
    # table_ref: VMEM (V_pad, E)  whole table, single resident copy
    # out_ref  : VMEM (tm, E)
    tm = out_ref.shape[0]
    v_pad = table_ref.shape[0]
    ids = ids_ref[...]                                         # (tm, 1)
    cols = jax.lax.broadcasted_iota(jnp.int32, (tm, v_pad), 1)
    onehot = (cols == ids).astype(table_ref.dtype)             # (tm, V_pad)
    acc = jnp.dot(onehot, table_ref[...], preferred_element_type=jnp.float32)
    out_ref[...] = (acc * scale).astype(out_ref.dtype)


# --------------------------------------------------------------------------
# Path 2: table resident in VMEM, 8-row batched gather.
# --------------------------------------------------------------------------
def _gather_vmem_kernel(ids_ref, table_ref, out_ref, *, scale, tm):
    # ids_ref  : SMEM (N_pad,) int32  (scalar-prefetched)
    # table_ref: VMEM (V, E)
    # out_ref  : VMEM (tm, E)
    base = pl.program_id(0) * tm
    v_max = table_ref.shape[0] - 1

    def body(g, carry):
        off = pl.multiple_of(g * 8, 8)          # sublane-aligned group offset
        rows = []
        for r in range(8):                       # 8 dynamic row reads
            tok = jnp.clip(ids_ref[base + off + r], 0, v_max)
            rows.append(table_ref[pl.ds(tok, 1), :])
        grp = jnp.concatenate(rows, axis=0)      # (8, E)
        # One unmasked (8, E) store; scale once per group in f32.
        out_ref[pl.ds(off, 8), :] = (
            grp.astype(jnp.float32) * scale).astype(out_ref.dtype)
        return carry

    jax.lax.fori_loop(0, tm // 8, body, 0, unroll=2)


# --------------------------------------------------------------------------
# Path 3: table stays in HBM; double-buffered DMA row gather (P4 pattern).
# --------------------------------------------------------------------------
def _gather_hbm_kernel(ids_ref, table_hbm, out_ref, gbuf, sems, *, scale, tm):
    # ids_ref  : SMEM (N_pad,) int32     (scalar-prefetched)
    # table_hbm: HBM  (V, E)             (memory_space=pl.ANY)
    # out_ref  : VMEM (tm, E)
    # gbuf     : VMEM (2, 8, E) scratch  (double-buffered 8-row groups)
    # sems     : DMA semaphores (2, 8)
    base = pl.program_id(0) * tm
    v_max = table_hbm.shape[0] - 1
    n_groups = tm // 8

    def start_group(g, slot):
        goff = g * 8
        for r in range(8):
            tok = jnp.clip(ids_ref[base + goff + r], 0, v_max)
            pltpu.make_async_copy(
                table_hbm.at[pl.ds(tok, 1), :],
                gbuf.at[slot, pl.ds(r, 1), :],
                sems.at[slot, r],
            ).start()

    def wait_group(slot):
        for r in range(8):
            pltpu.make_async_copy(
                table_hbm.at[pl.ds(0, 1), :],
                gbuf.at[slot, pl.ds(r, 1), :],
                sems.at[slot, r],
            ).wait()

    start_group(0, 0)

    def body(g, carry):
        slot = jax.lax.rem(g, 2)
        wait_group(slot)

        @pl.when(g + 1 < n_groups)
        def _():
            start_group(g + 1, 1 - slot)

        off = pl.multiple_of(g * 8, 8)
        grp = gbuf[slot]                          # (8, E)
        out_ref[pl.ds(off, 8), :] = (
            grp.astype(jnp.float32) * scale).astype(out_ref.dtype)
        return carry

    jax.lax.fori_loop(0, n_groups, body, 0)


# --------------------------------------------------------------------------
# Wrapper / dispatch
# --------------------------------------------------------------------------
def token_embedding(tokens, table, *, tm=None, path=None):
    """tokens: integer array (any shape); table: (vocab_size, emb_size)."""
    lead_shape = tokens.shape
    V, E = table.shape
    N = int(math.prod(lead_shape)) if lead_shape else 1
    dtype = table.dtype
    itemsize = jnp.dtype(dtype).itemsize
    scale = math.sqrt(E)

    vmem_cap = _device_vmem_bytes()
    table_bytes = V * E * itemsize

    # Row tile: 512 amortizes per-grid-step overhead well (v6e/v7x); clamp for
    # tiny inputs and so 2x output tile stays well under the VMEM budget.
    if tm is None:
        tm = 512
    tm = max(8, min(int(tm), _round_up(max(N, 1), 8)))
    max_tile_rows = max(8, ((vmem_cap // 8) // max(E * itemsize, 1)) // 8 * 8)
    tm = min(_round_up(tm, 8), max_tile_rows)

    n_tiles = pl.cdiv(N, tm)
    n_pad = n_tiles * tm
    out_tile_bytes = tm * E * itemsize

    ids = tokens.reshape(N).astype(jnp.int32)  # '.long()' equivalent index cast
    if n_pad != N:
        ids = jnp.concatenate([ids, jnp.zeros((n_pad - N,), jnp.int32)])

    if path is None:
        if V <= 1024:
            path = "onehot"              # small vocab: MXU one-hot matmul
        elif table_bytes <= vmem_cap // 2:
            path = "vmem"                # table fits comfortably per core
        else:
            path = "hbm"                 # large table: DMA row gather from HBM

    if path == "onehot":
        v_pad = _round_up(V, 128)
        table_p = table if v_pad == V else jnp.concatenate(
            [table, jnp.zeros((v_pad - V, E), dtype)], axis=0)
        ids2d = ids.reshape(n_pad, 1)
        vmem_limit = int(min(vmem_cap, max(
            16 << 20,
            v_pad * E * itemsize + 2 * out_tile_bytes + 2 * tm * v_pad * 4 + (2 << 20))))
        out_flat = pl.pallas_call(
            functools.partial(_onehot_kernel, scale=scale),
            out_shape=jax.ShapeDtypeStruct((n_pad, E), dtype),
            grid=(n_tiles,),
            in_specs=[
                pl.BlockSpec((tm, 1), lambda i: (i, 0)),
                pl.BlockSpec(memory_space=pltpu.MemorySpace.VMEM),
            ],
            out_specs=pl.BlockSpec((tm, E), lambda i: (i, 0)),
            compiler_params=pltpu.CompilerParams(
                dimension_semantics=("parallel",),
                vmem_limit_bytes=vmem_limit),
        )(ids2d, table_p)

    elif path == "vmem":
        vmem_limit = int(min(vmem_cap, max(
            16 << 20, table_bytes + 2 * out_tile_bytes + (2 << 20))))
        out_flat = pl.pallas_call(
            functools.partial(_gather_vmem_kernel, scale=scale, tm=tm),
            out_shape=jax.ShapeDtypeStruct((n_pad, E), dtype),
            grid_spec=pltpu.PrefetchScalarGridSpec(
                num_scalar_prefetch=1,          # token ids -> SMEM
                grid=(n_tiles,),
                in_specs=[
                    # Whole table resident in VMEM, outside the pipeline.
                    pl.BlockSpec(memory_space=pltpu.MemorySpace.VMEM),
                ],
                out_specs=pl.BlockSpec((tm, E), lambda i, ids: (i, 0)),
            ),
            compiler_params=pltpu.CompilerParams(
                dimension_semantics=("parallel",),
                vmem_limit_bytes=vmem_limit),
        )(ids, table)

    else:  # "hbm"
        vmem_limit = int(min(vmem_cap, max(
            16 << 20, 2 * out_tile_bytes + 2 * 8 * E * itemsize + (4 << 20))))
        out_flat = pl.pallas_call(
            functools.partial(_gather_hbm_kernel, scale=scale, tm=tm),
            out_shape=jax.ShapeDtypeStruct((n_pad, E), dtype),
            grid_spec=pltpu.PrefetchScalarGridSpec(
                num_scalar_prefetch=1,
                grid=(n_tiles,),
                in_specs=[pl.BlockSpec(memory_space=pl.ANY)],  # table stays in HBM
                out_specs=pl.BlockSpec((tm, E), lambda i, ids: (i, 0)),
                scratch_shapes=[
                    pltpu.VMEM((2, 8, E), dtype),
                    pltpu.SemaphoreType.DMA((2, 8)),
                ],
            ),
            compiler_params=pltpu.CompilerParams(
                dimension_semantics=("parallel",),
                vmem_limit_bytes=vmem_limit),
        )(ids, table)

    return out_flat[:N].reshape(*lead_shape, E)


if __name__ == "__main__":
    vocab_size = 64
    emb_size = 128
    B, S = 2, 8

    key = jax.random.PRNGKey(0)
    k_w, k_t, k_t2 = jax.random.split(key, 3)

    # nn.Embedding default init: weight ~ N(0, 1)
    table = jax.random.normal(k_w, (vocab_size, emb_size), dtype=jnp.float32)
    tokens = jax.random.randint(k_t, (B, S), 0, vocab_size, dtype=jnp.int32)
    ref = table[tokens] * math.sqrt(emb_size)

    # Default dispatch (small vocab -> one-hot MXU path).
    out = jax.block_until_ready(token_embedding(tokens, table))
    assert out.shape == (B, S, emb_size)
    assert jnp.allclose(out, ref, atol=1e-5, rtol=1e-5)

    # VMEM-resident-table batched-gather path.
    out_v = jax.block_until_ready(token_embedding(tokens, table, path="vmem"))
    assert jnp.allclose(out_v, ref, atol=1e-5, rtol=1e-5)

    # HBM-resident-table DMA-gather path (auto-selected for large tables).
    out_h = jax.block_until_ready(token_embedding(tokens, table, path="hbm"))
    assert jnp.allclose(out_h, ref, atol=1e-5, rtol=1e-5)

    # Non-tile-divisible token count exercises the padding path.
    tokens2 = jax.random.randint(k_t2, (3, 5), 0, vocab_size, dtype=jnp.int32)
    ref2 = table[tokens2] * math.sqrt(emb_size)
    out2 = jax.block_until_ready(token_embedding(tokens2, table, path="vmem"))
    assert out2.shape == (3, 5, emb_size)
    assert jnp.allclose(out2, ref2, atol=1e-5, rtol=1e-5)

    print("KERNEL_OK")
</pallas_src>

<mosaic_0001>
module attributes {stable_mosaic.version = 11 : i64} {
  func.func @_onehot_kernel(%arg0: i32, %arg1: memref<16x1xi32, #tpu.memory_space<vmem>>, %arg2: memref<128x128xf32, #tpu.memory_space<vmem>>, %arg3: memref<16x128xf32, #tpu.memory_space<vmem>>) attributes {dimension_semantics = [#tpu.dimension_semantics<parallel>], iteration_bounds = array<i64: 1>, scalar_prefetch = 0 : i64, scratch_operands = 0 : i64, tpu.core_type = #tpu.core_type<tc>, window_params = [{transform_indices = @transform_0, window_bounds = array<i64: 16, 1>}, {pipeline_mode = #tpu.pipeline_mode<synchronous>, transform_indices = @transform_1, window_bounds = array<i64: 128, 128>}, {transform_indices = @transform_2, window_bounds = array<i64: 16, 128>}]} {
    %c0 = arith.constant 0 : index
    %c0_0 = arith.constant 0 : index
    %0 = vector.load %arg1[%c0, %c0_0] : memref<16x1xi32, #tpu.memory_space<vmem>>, vector<16x1xi32>
    %1 = tpu.iota {dimensions = array<i32: 1>} : vector<16x128xi32>
    %2 = vector.broadcast %0 : vector<16x1xi32> to vector<16x128xi32>
    %3 = arith.cmpi eq, %1, %2 : vector<16x128xi32>
    %4 = arith.extui %3 : vector<16x128xi1> to vector<16x128xi32>
    %5 = arith.sitofp %4 : vector<16x128xi32> to vector<16x128xf32>
    %c0_1 = arith.constant 0 : index
    %c0_2 = arith.constant 0 : index
    %6 = vector.load %arg2[%c0_1, %c0_2] : memref<128x128xf32, #tpu.memory_space<vmem>>, vector<128x128xf32>
    %cst = arith.constant dense<0.000000e+00> : vector<16x128xf32>
    %7 = tpu.matmul %5, %6, %cst {dimension_numbers = #tpu.dot_dimension_numbers<[1], [0], [0], [1], [0, 0, 1, 1], [], []>} : vector<16x128xf32>, vector<128x128xf32>, vector<16x128xf32> -> vector<16x128xf32>
    %cst_3 = arith.constant 11.3137083 : f32
    %8 = vector.broadcast %cst_3 : f32 to vector<16x128xf32>
    %9 = arith.mulf %7, %8 : vector<16x128xf32>
    %c0_4 = arith.constant 0 : index
    %c0_5 = arith.constant 0 : index
    %10 = vector.load %arg3[%c0_4, %c0_5] : memref<16x128xf32, #tpu.memory_space<vmem>>, vector<16x128xf32>
    tpu.vector_store %arg3[%c0_4, %c0_5], %9 {strides = array<i32>} : memref<16x128xf32, #tpu.memory_space<vmem>>, vector<16x128xf32>,
    return
  }
  func.func @transform_0(%arg0: i32) -> (i32, i32) {
    %c0_i32 = arith.constant 0 : i32
    %c0_i32_0 = arith.constant 0 : i32
    return %arg0, %c0_i32 : i32, i32
  }
  func.func @transform_1(%arg0: i32) -> (i32, i32) {
    %c0_i32 = arith.constant 0 : i32
    %c0_i32_0 = arith.constant 0 : i32
    %c0_i32_1 = arith.constant 0 : i32
    return %c0_i32, %c0_i32_0 : i32, i32
  }
  func.func @transform_2(%arg0: i32) -> (i32, i32) {
    %c0_i32 = arith.constant 0 : i32
    %c0_i32_0 = arith.constant 0 : i32
    return %arg0, %c0_i32 : i32, i32
  }
}

</mosaic_0001>

<bundles_post_ra>
// kernel: tpu_custom_call.1
= control target key start
LH: loop header
LB: loop body
LE: loop exit
PB: predicated region body
PF: predicated region fallthrough
CT: control target
= control target key end

     0   :  { %7 = vsyncpa [#allocation3], 0  ;;  %s301_s0 = inlined_call_operand.vmem [shape: s32[16,1], index: 0, kind: input, shape index: {}]   ;;  %s302_s1 = inlined_call_operand.hbm [shape: f32[128,128], index: 1, kind: input, shape index: {}]   ;;  %s303_s2 = inlined_call_operand.hbm [shape: f32[16,128], index: 2, kind: output, shape index: {}]  }
   0x1   :  { %8 = vsyncpa [#allocation4], 0  ;;  %s262_s9 = smov [#allocation2]  }
   0x2   :  { %s16_s10 = sshll.u32 %s262_s9, 4  ;;  %s17_s10 = int_to_ptr.vmem [resolvable:$true] %s16_s10 }
   0x3   :  { %s226_s11 = scalar_lea.vmem %s17_s10, 2048  ;;  %p231_p1 = scmp.lt.s32.totalorder %s17_s10, %s17_s10 }
   0x4   :  { %p227_p0 = scmp.ne.s32.totalorder %s17_s10, %s226_s11  ;;  %p232_p2 = scmp.lt.s32.totalorder %s226_s11, %s226_s11 }
   0x6   :  { %p233_p3 = por %p232_p2, %p231_p1 }
   0x8   :  { %p234_p4 = pnand %p233_p3, %p227_p0 }
   0xa   :  { %237 = shalt.err (!%p234_p4)
}
   0xb   :  { %s263_s12 = smov 128   ;;  %s264_s13 = smov 8  }
   0xc   :  { %22 = dma.hbm_to_vmem [thread:$0]  %s302_s1, 2048, %s17_s10, [#allocation3], %s263_s12, %s263_s12, %s264_s13  }
   0xd   :  { %258 = dma.done.wait [#allocation3], 2048  }
   0xe   :  { %259 = vsyncadd [#allocation3], 4294965248  ;;  %v265_v0 = vmov 0   ;;  %v26_v1 = vld [vmem:[%s301_s0] sm:$0xff]  ;;  %v57_v2 = vld [vmem:[#allocation2 + $0x78] sm:$0xff]  ;;  %v28_v19 = vlaneseq  ;;  %v266_v22 = vmov 1.0  }
   0xf   :  { %217 = vset.pattern.permute.xlu0 %v265_v0  ;;  %176 = vmatprep.subr.mxu0 %v57_v2  ;;  %v56_v3 = vld [vmem:[#allocation2 + $0x70] sm:$0xff]  ;;  %v27_v4 = vld [vmem:[%s301_s0 + $0x8] sm:$0xff]  ;;  %v54_v6 = vld [vmem:[#allocation2 + $0x60] sm:$0xff]  ;;  %s267_s0 = smov [#allocation5]  }
  0x10   :  { %31 = vperm.xlu0 %217, %v26_v1   ;;  %177 = vmatpush3.msra.mxu0 %v57_v2  ;;  %v55_v5 = vld [vmem:[#allocation2 + $0x68] sm:$0xff]  ;;  %v53_v7 = vld [vmem:[#allocation2 + $0x58] sm:$0xff]  ;;  %v52_v8 = vld [vmem:[#allocation2 + $0x50] sm:$0xff]  ;;  %v29_v20 = vand.u32 127, %v28_v19  ;;  %s142_s1 = sshll.u32 %s267_s0, 4  ;;  %s143_s1 = int_to_ptr.vmem [resolvable:$true] %s142_s1 }
  0x11   :  { %178 = vmatprep.subr.mxu0 %v56_v3  ;;  %v51_v9 = vld [vmem:[#allocation2 + $0x48] sm:$0xff]  ;;  %v50_v10 = vld [vmem:[#allocation2 + $0x40] sm:$0xff]  ;;  %v49_v11 = vld [vmem:[#allocation2 + $0x38] sm:$0xff]  ;;  %s238_s20 = scalar_lea.vmem %s143_s1, 256  ;;  %p243_p6 = scmp.lt.s32.totalorder %s143_s1, %s143_s1 }
  0x12   :  { %179 = vmatpush3.msra.mxu0 %v56_v3  ;;  %v48_v12 = vld [vmem:[#allocation2 + $0x30] sm:$0xff]  ;;  %v47_v13 = vld [vmem:[#allocation2 + $0x28] sm:$0xff]  ;;  %v46_v14 = vld [vmem:[#allocation2 + $0x20] sm:$0xff]  ;;  %p239_p5 = scmp.ne.s32.totalorder %s143_s1, %s238_s20  ;;  %p244_p7 = scmp.lt.s32.totalorder %s238_s20, %s238_s20 }
  0x13   :  { %180 = vmatprep.subr.mxu0 %v55_v5  ;;  %v45_v15 = vld [vmem:[#allocation2 + $0x18] sm:$0xff]  ;;  %v44_v16 = vld [vmem:[#allocation2 + $0x10] sm:$0xff]  ;;  %v43_v17 = vld [vmem:[#allocation2 + $0x8] sm:$0xff] }
  0x14   :  { %34 = vperm.xlu0 %217, %v27_v4   ;;  %181 = vmatpush3.msra.mxu0 %v55_v5  ;;  %v42_v18 = vld [vmem:[#allocation2] sm:$0xff]  ;;  %p245_p8 = por %p244_p7, %p243_p6 }
  0x15   :  { %182 = vmatprep.subr.mxu0 %v54_v6 }
  0x16   :  { %183 = vmatpush3.msra.mxu0 %v54_v6  ;;  %p246_p9 = pnand %p245_p8, %p239_p5 }
  0x17   :  { %184 = vmatprep.subr.mxu0 %v53_v7 }
  0x18   :  { %185 = vmatpush3.msra.mxu0 %v53_v7 }
  0x19   :  { %186 = vmatprep.subr.mxu0 %v52_v8 }
  0x1a   :  { %187 = vmatpush3.msra.mxu0 %v52_v8 }
  0x1b   :  { %188 = vmatprep.subr.mxu0 %v51_v9 }
  0x1c   :  { %189 = vmatpush3.msra.mxu0 %v51_v9 }
  0x1d   :  { %190 = vmatprep.subr.mxu0 %v50_v10 }
  0x1e   :  { %191 = vmatpush3.msra.mxu0 %v50_v10 }
  0x1f   :  { %192 = vmatprep.subr.mxu0 %v49_v11 }
  0x20   :  { %193 = vmatpush3.msra.mxu0 %v49_v11 }
  0x21   :  { %194 = vmatprep.subr.mxu0 %v48_v12 }
  0x22   :  { %195 = vmatpush3.msra.mxu0 %v48_v12 }
  0x23   :  { %196 = vmatprep.subr.mxu0 %v47_v13 }
  0x24   :  { %197 = vmatpush3.msra.mxu0 %v47_v13 }
  0x25   :  { %198 = vmatprep.subr.mxu0 %v46_v14 }
  0x26   :  { %199 = vmatpush3.msra.mxu0 %v46_v14 }
  0x27   :  { %200 = vmatprep.subr.mxu0 %v45_v15 }
  0x28   :  { %201 = vmatpush3.msra.mxu0 %v45_v15 }
  0x29   :  { %202 = vmatprep.subr.mxu0 %v44_v16 }
  0x2a   :  { %203 = vmatpush3.msra.mxu0 %v44_v16 }
  0x2b   :  { %204 = vmatprep.subr.mxu0 %v43_v17 }
  0x2c   :  { %205 = vmatpush3.msra.mxu0 %v43_v17 }
  0x2d   :  { %206 = vmatprep.subr.mxu0 %v42_v18 }
  0x2e   :  { %207 = vmatpush3.msra.mxu0 %v42_v18 }
  0x8b   :  { %v32_v21 = vpop.permute.xlu0 %31 }
  0x8c   :  { %vm36_vm0 = vcmp.eq.s32.totalorder %v29_v20, %v32_v21 }
  0x8d   :  { %208 = vmatprep.mubr.msk.f32.mxu0 %vm36_vm0, %v266_v22 }
  0x8f   :  { %v35_v23 = vpop.permute.xlu0 %34 }
  0x90   :  { %vm37_vm1 = vcmp.eq.s32.totalorder %v29_v20, %v35_v23 }
  0x91   :  { %209 = vmatmul.mubr.msk.f32.vlgmr.msra.gmra.mxu0 %vm37_vm1, %v266_v22 }
 0x151   :  { %v210_v24 = vpop.f32.mrf.mxu0 }
 0x152   :  { %v134_v25 = vmul.f32 11.313708, %v210_v24 }
 0x153   :  { %v124_v26 = vpop.f32.mrf.mxu0 }
 0x154   :  { %136 = vst [vmem:[#allocation5 + $0x8] sm:$0xff] %v134_v25  ;;  %v133_v27 = vmul.f32 11.313708, %v124_v26 }
 0x156   :  { %135 = vst [vmem:[#allocation5] sm:$0xff] %v133_v27 }
 0x157   :  { %249 = shalt.err (!%p246_p9)
}
 0x158   :  { %148 = dma.vmem_to_hbm [thread:$0]  %s143_s1, 256, %s303_s2, [#allocation4], %s263_s12, %s263_s12, %s264_s13  }
 0x159   :  { %260 = dma.done.wait [#allocation4], 256  }
 0x15a   :  { %261 = vsyncadd [#allocation4], 4294967040 }
 0x15b   :  { %152 = vsyncpa [#allocation3], 1 }
 0x15c   :  { %153 = vsyncpa [#allocation4], 1 }

</bundles_post_ra>
